<compile_context>
chip_gen: v5e
topology: v5e:2x2
jax: 0.10.0
libtpu: 0.0.40
codegen_flags: <defaults>
</compile_context>

<pallas_src>
import functools

import jax
import jax.numpy as jnp
import numpy as np
from jax.experimental import pallas as pl
from jax.experimental.pallas import tpu as pltpu


def _conv_single_matmul(x_ref, w_ref, xcol_ref, *, K, pad):
    """Conv1d (stride 1, zero padding) for one batch element as ONE MXU matmul.

    x_ref:    (L, C_in)        input block (length on sublanes, channels on lanes)
    w_ref:    (K*C_in, C_pad)  conv taps flattened into the contraction dim
    xcol_ref: (L_conv, K*C_in) VMEM scratch for the im2col slab
    """
    L, C_in = x_ref.shape
    L_conv = L + 2 * pad - K + 1
    xcol_ref[...] = jnp.zeros_like(xcol_ref)          # halo columns stay zero (in-kernel pad)
    for k in range(K):                                # K is tiny (3): static unroll
        lo = max(0, pad - k)                          # conv rows whose tap-k read is in bounds
        hi = min(L_conv, L + pad - k)
        if hi > lo:
            xcol_ref[lo:hi, k * C_in:(k + 1) * C_in] = (
                x_ref[lo + k - pad: hi + k - pad, :].astype(jnp.float32))
    return jnp.dot(xcol_ref[...], w_ref[...],
                   preferred_element_type=jnp.float32)            # (L_conv, C_pad)


def conv_stats_kernel(x_ref, w_ref, sum_ref, ssq_ref, xcol_ref, *, K, pad):
    """Pass 1: conv + fused single-sweep per-channel sum and sum-of-squares."""
    conv = _conv_single_matmul(x_ref, w_ref, xcol_ref, K=K, pad=pad)  # (L_conv, C_pad)
    sum_ref[...] = jnp.sum(conv, axis=0, keepdims=True)              # (1, C_pad)
    ssq_ref[...] = jnp.sum(conv * conv, axis=0, keepdims=True)       # (1, C_pad)


def conv_bn_pool_relu_kernel(x_ref, w_ref, scale_ref, shift_ref, out_ref, xcol_ref,
                             *, K, pad):
    """Pass 2: conv + folded BN affine + MaxPool1d(2,2) + ReLU, one lane-dense store."""
    conv = _conv_single_matmul(x_ref, w_ref, xcol_ref, K=K, pad=pad)  # (L_conv, C_pad)
    bn = conv * scale_ref[...] + shift_ref[...]                       # BN folded to one affine
    L_pool, C_pad = out_ref.shape
    L_conv = conv.shape[0]
    # MaxPool1d(2, 2): pick even / odd conv rows with two tiny constant selection matmuls
    # (MXU is idle at these channel counts). This avoids sublane-strided slices/reshuffles
    # and per-row masked stores; the result is written with one unmasked full-tile store.
    row = jax.lax.broadcasted_iota(jnp.int32, (L_pool, L_conv), 0)
    col = jax.lax.broadcasted_iota(jnp.int32, (L_pool, L_conv), 1)
    sel_even = (col == 2 * row).astype(jnp.float32)
    sel_odd = (col == 2 * row + 1).astype(jnp.float32)
    even = jnp.dot(sel_even, bn, preferred_element_type=jnp.float32)  # (L_pool, C_pad)
    odd = jnp.dot(sel_odd, bn, preferred_element_type=jnp.float32)
    out_ref[...] = jnp.maximum(jnp.maximum(even, odd), 0.0).astype(out_ref.dtype)


def basic_block_forward(x, conv_weight, bn_gamma, bn_beta,
                        *, kernel_size=3, stride=1, padding=1, eps=1e-5):
    """x: (N, C_in, L) float32 (PyTorch NCL). Returns (N, C_out, floor(L_conv/2))."""
    assert stride == 1, "only stride=1 (module default) is implemented"
    # TODO(synk): general conv stride would need a strided im2col gather; defaults only.
    N, C_in, L = x.shape
    C_out, C_in_w, K = conv_weight.shape
    assert C_in_w == C_in and K == kernel_size
    L_conv = (L + 2 * padding - K) // stride + 1
    L_pool = L_conv // 2
    C_pad = ((C_out + 127) // 128) * 128           # lane-dense output channels

    # --- one-time parameter packing (tiny) -------------------------------------------
    # weight (C_out, C_in, K) -> (K*C_in, C_pad): conv becomes ONE matmul per block.
    w_mat = jnp.transpose(conv_weight, (2, 1, 0)).reshape(K * C_in, C_out).astype(jnp.float32)
    w_mat = jnp.pad(w_mat, ((0, 0), (0, C_pad - C_out)))
    gamma = jnp.pad(bn_gamma.astype(jnp.float32), (0, C_pad - C_out)).reshape(1, C_pad)
    beta = jnp.pad(bn_beta.astype(jnp.float32), (0, C_pad - C_out)).reshape(1, C_pad)

    # --- NCL -> NLC (length on sublanes, channels on lanes) ---------------------------
    # TODO(synk): this transpose is still one wrapper-side HBM pass; feed NLC activations
    # from the previous layer (or fold the transpose in-kernel) for a fully fused stack.
    x_nlc = jnp.transpose(x, (0, 2, 1)).astype(jnp.float32)          # (N, L, C_in)

    cparams = pltpu.CompilerParams(
        dimension_semantics=("parallel",),          # batch axis shards across v7x's 2 TCs
        vmem_limit_bytes=32 * 1024 * 1024)          # explicit budget; safe on 64 MiB v7x VMEM

    x_spec = pl.BlockSpec((None, L, C_in), lambda n: (n, 0, 0))
    w_spec = pl.BlockSpec((K * C_in, C_pad), lambda n: (0, 0))
    vec_spec = pl.BlockSpec((1, C_pad), lambda n: (0, 0))
    scratch = [pltpu.VMEM((L_conv, K * C_in), jnp.float32)]          # im2col slab

    # --- pass 1: conv + per-batch-block channel sums (grid over N, parallel) ----------
    psum, pssq = pl.pallas_call(
        functools.partial(conv_stats_kernel, K=K, pad=padding),
        grid=(N,),
        in_specs=[x_spec, w_spec],
        out_specs=(pl.BlockSpec((None, 1, C_pad), lambda n: (n, 0, 0)),
                   pl.BlockSpec((None, 1, C_pad), lambda n: (n, 0, 0))),
        out_shape=(jax.ShapeDtypeStruct((N, 1, C_pad), jnp.float32),
                   jax.ShapeDtypeStruct((N, 1, C_pad), jnp.float32)),
        scratch_shapes=scratch,
        compiler_params=cparams,
    )(x_nlc, w_mat)

    # --- tiny cross-block reduction + BN affine fold ((1, C_pad) math, negligible) ----
    cnt = float(N * L_conv)
    mean = jnp.sum(psum[:, 0, :], axis=0, keepdims=True) / cnt                       # (1, C_pad)
    var = jnp.maximum(jnp.sum(pssq[:, 0, :], axis=0, keepdims=True) / cnt - mean * mean, 0.0)
    scale = gamma * jax.lax.rsqrt(var + eps)
    shift = beta - mean * scale

    # --- pass 2: conv (recomputed) + BN affine + MaxPool(2,2) + ReLU -------------------
    out_nlc = pl.pallas_call(
        functools.partial(conv_bn_pool_relu_kernel, K=K, pad=padding),
        grid=(N,),
        in_specs=[x_spec, w_spec, vec_spec, vec_spec],
        out_specs=pl.BlockSpec((None, L_pool, C_pad), lambda n: (n, 0, 0)),
        out_shape=jax.ShapeDtypeStruct((N, L_pool, C_pad), jnp.float32),
        scratch_shapes=scratch,
        compiler_params=cparams,
    )(x_nlc, w_mat, scale, shift)

    # --- drop channel padding, back to PyTorch layout (N, C_out, L_pool) ---------------
    return jnp.transpose(out_nlc[:, :, :C_out], (0, 2, 1))


def reference_forward(x, conv_weight, bn_gamma, bn_beta, eps=1e-5):
    """Pure-JAX reference with PyTorch semantics (training-mode BN)."""
    conv = jax.lax.conv_general_dilated(
        x, conv_weight, window_strides=(1,), padding=((1, 1),),
        dimension_numbers=("NCH", "OIH", "NCH"))
    mean = conv.mean(axis=(0, 2), keepdims=True)
    var = ((conv - mean) ** 2).mean(axis=(0, 2), keepdims=True)
    bn = (conv - mean) / jnp.sqrt(var + eps) * bn_gamma[None, :, None] + bn_beta[None, :, None]
    N, C, L = bn.shape
    pooled = bn[:, :, : (L // 2) * 2].reshape(N, C, L // 2, 2).max(axis=-1)
    return jnp.maximum(pooled, 0.0)


if __name__ == "__main__":
    key = jax.random.PRNGKey(0)
    k1, k2, k3, k4 = jax.random.split(key, 4)

    N, C_in, C_out, L, K = 2, 4, 8, 16, 3
    x = jax.random.normal(k1, (N, C_in, L), jnp.float32)
    conv_weight = 0.2 * jax.random.normal(k2, (C_out, C_in, K), jnp.float32)
    bn_gamma = 1.0 + 0.1 * jax.random.normal(k3, (C_out,), jnp.float32)
    bn_beta = 0.1 * jax.random.normal(k4, (C_out,), jnp.float32)

    out = jax.block_until_ready(basic_block_forward(x, conv_weight, bn_gamma, bn_beta))
    ref = jax.block_until_ready(reference_forward(x, conv_weight, bn_gamma, bn_beta))
    np.testing.assert_allclose(np.asarray(out), np.asarray(ref), rtol=1e-3, atol=1e-3)

    print("KERNEL_OK")
</pallas_src>

<mosaic_0001>
module attributes {stable_mosaic.version = 11 : i64} {
  func.func @conv_stats_kernel(%arg0: i32, %arg1: memref<1x16x4xf32, #tpu.memory_space<vmem>>, %arg2: memref<12x128xf32, #tpu.memory_space<vmem>>, %arg3: memref<1x1x128xf32, #tpu.memory_space<vmem>>, %arg4: memref<1x1x128xf32, #tpu.memory_space<vmem>>, %arg5: memref<16x12xf32, #tpu.memory_space<vmem>>) attributes {dimension_semantics = [#tpu.dimension_semantics<parallel>], iteration_bounds = array<i64: 2>, scalar_prefetch = 0 : i64, scratch_operands = 1 : i64, tpu.core_type = #tpu.core_type<tc>, window_params = [{transform_indices = @transform_0, window_bounds = array<i64: 1, 16, 4>}, {pipeline_mode = #tpu.pipeline_mode<synchronous>, transform_indices = @transform_1, window_bounds = array<i64: 12, 128>}, {transform_indices = @transform_2, window_bounds = array<i64: 1, 1, 128>}, {transform_indices = @transform_3, window_bounds = array<i64: 1, 1, 128>}]} {
    %cst = arith.constant 0.000000e+00 : f32
    %0 = vector.broadcast %cst : f32 to vector<16x12xf32>
    %c0 = arith.constant 0 : index
    %c0_0 = arith.constant 0 : index
    %1 = vector.load %arg5[%c0, %c0_0] : memref<16x12xf32, #tpu.memory_space<vmem>>, vector<16x12xf32>
    tpu.vector_store %arg5[%c0, %c0_0], %0 {strides = array<i32>} : memref<16x12xf32, #tpu.memory_space<vmem>>, vector<16x12xf32>,
    %c0_1 = arith.constant 0 : index
    %c0_2 = arith.constant 0 : index
    %c0_3 = arith.constant 0 : index
    %2 = vector.load %arg1[%c0_1, %c0_2, %c0_3] : memref<1x16x4xf32, #tpu.memory_space<vmem>>, vector<1x15x4xf32>
    %3 = vector.shape_cast %2 : vector<1x15x4xf32> to vector<15x4xf32>
    %c1 = arith.constant 1 : index
    %c0_4 = arith.constant 0 : index
    %4 = vector.load %arg5[%c1, %c0_4] : memref<16x12xf32, #tpu.memory_space<vmem>>, vector<15x4xf32>
    tpu.vector_store %arg5[%c1, %c0_4], %3 {strides = array<i32>} : memref<16x12xf32, #tpu.memory_space<vmem>>, vector<15x4xf32>,
    %c0_5 = arith.constant 0 : index
    %c0_6 = arith.constant 0 : index
    %c0_7 = arith.constant 0 : index
    %5 = vector.load %arg1[%c0_5, %c0_6, %c0_7] : memref<1x16x4xf32, #tpu.memory_space<vmem>>, vector<1x16x4xf32>
    %6 = vector.shape_cast %5 : vector<1x16x4xf32> to vector<16x4xf32>
    %c0_8 = arith.constant 0 : index
    %c4 = arith.constant 4 : index
    %7 = vector.load %arg5[%c0_8, %c4] : memref<16x12xf32, #tpu.memory_space<vmem>>, vector<16x4xf32>
    tpu.vector_store %arg5[%c0_8, %c4], %6 {strides = array<i32>} : memref<16x12xf32, #tpu.memory_space<vmem>>, vector<16x4xf32>,
    %c0_9 = arith.constant 0 : index
    %c1_10 = arith.constant 1 : index
    %c0_11 = arith.constant 0 : index
    %8 = vector.load %arg1[%c0_9, %c1_10, %c0_11] : memref<1x16x4xf32, #tpu.memory_space<vmem>>, vector<1x15x4xf32>
    %9 = vector.shape_cast %8 : vector<1x15x4xf32> to vector<15x4xf32>
    %c0_12 = arith.constant 0 : index
    %c8 = arith.constant 8 : index
    %10 = vector.load %arg5[%c0_12, %c8] : memref<16x12xf32, #tpu.memory_space<vmem>>, vector<15x4xf32>
    tpu.vector_store %arg5[%c0_12, %c8], %9 {strides = array<i32>} : memref<16x12xf32, #tpu.memory_space<vmem>>, vector<15x4xf32>,
    %c0_13 = arith.constant 0 : index
    %c0_14 = arith.constant 0 : index
    %11 = vector.load %arg5[%c0_13, %c0_14] : memref<16x12xf32, #tpu.memory_space<vmem>>, vector<16x12xf32>
    %c0_15 = arith.constant 0 : index
    %c0_16 = arith.constant 0 : index
    %12 = vector.load %arg2[%c0_15, %c0_16] : memref<12x128xf32, #tpu.memory_space<vmem>>, vector<12x128xf32>
    %cst_17 = arith.constant dense<0.000000e+00> : vector<16x128xf32>
    %13 = tpu.matmul %11, %12, %cst_17 {dimension_numbers = #tpu.dot_dimension_numbers<[1], [0], [0], [1], [0, 0, 1, 1], [], []>} : vector<16x12xf32>, vector<12x128xf32>, vector<16x128xf32> -> vector<16x128xf32>
    %cst_18 = arith.constant dense<0.000000e+00> : vector<128xf32>
    %14 = vector.multi_reduction <add>, %13, %cst_18 [0] : vector<16x128xf32> to vector<128xf32>
    %15 = vector.shape_cast %14 : vector<128xf32> to vector<1x128xf32>
    %c0_19 = arith.constant 0 : index
    %c0_20 = arith.constant 0 : index
    %c0_21 = arith.constant 0 : index
    %16 = vector.load %arg3[%c0_19, %c0_20, %c0_21] : memref<1x1x128xf32, #tpu.memory_space<vmem>>, vector<1x1x128xf32>
    %17 = vector.shape_cast %16 : vector<1x1x128xf32> to vector<1x128xf32>
    %18 = vector.shape_cast %15 : vector<1x128xf32> to vector<1x1x128xf32>
    tpu.vector_store %arg3[%c0_19, %c0_20, %c0_21], %18 {strides = array<i32>} : memref<1x1x128xf32, #tpu.memory_space<vmem>>, vector<1x1x128xf32>,
    %19 = arith.mulf %13, %13 : vector<16x128xf32>
    %cst_22 = arith.constant dense<0.000000e+00> : vector<128xf32>
    %20 = vector.multi_reduction <add>, %19, %cst_22 [0] : vector<16x128xf32> to vector<128xf32>
    %21 = vector.shape_cast %20 : vector<128xf32> to vector<1x128xf32>
    %c0_23 = arith.constant 0 : index
    %c0_24 = arith.constant 0 : index
    %c0_25 = arith.constant 0 : index
    %22 = vector.load %arg4[%c0_23, %c0_24, %c0_25] : memref<1x1x128xf32, #tpu.memory_space<vmem>>, vector<1x1x128xf32>
    %23 = vector.shape_cast %22 : vector<1x1x128xf32> to vector<1x128xf32>
    %24 = vector.shape_cast %21 : vector<1x128xf32> to vector<1x1x128xf32>
    tpu.vector_store %arg4[%c0_23, %c0_24, %c0_25], %24 {strides = array<i32>} : memref<1x1x128xf32, #tpu.memory_space<vmem>>, vector<1x1x128xf32>,
    return
  }
  func.func @transform_0(%arg0: i32) -> (i32, i32, i32) {
    %c0_i32 = arith.constant 0 : i32
    %c0_i32_0 = arith.constant 0 : i32
    %c0_i32_1 = arith.constant 0 : i32
    return %arg0, %c0_i32, %c0_i32_0 : i32, i32, i32
  }
  func.func @transform_1(%arg0: i32) -> (i32, i32) {
    %c0_i32 = arith.constant 0 : i32
    %c0_i32_0 = arith.constant 0 : i32
    %c0_i32_1 = arith.constant 0 : i32
    return %c0_i32, %c0_i32_0 : i32, i32
  }
  func.func @transform_2(%arg0: i32) -> (i32, i32, i32) {
    %c0_i32 = arith.constant 0 : i32
    %c0_i32_0 = arith.constant 0 : i32
    %c0_i32_1 = arith.constant 0 : i32
    return %arg0, %c0_i32, %c0_i32_0 : i32, i32, i32
  }
  func.func @transform_3(%arg0: i32) -> (i32, i32, i32) {
    %c0_i32 = arith.constant 0 : i32
    %c0_i32_0 = arith.constant 0 : i32
    %c0_i32_1 = arith.constant 0 : i32
    return %arg0, %c0_i32, %c0_i32_0 : i32, i32, i32
  }
}

</mosaic_0001>

<bundles_post_ra>
// kernel: tpu_custom_call.1
= control target key start
LH: loop header
LB: loop body
LE: loop exit
PB: predicated region body
PF: predicated region fallthrough
CT: control target
= control target key end

     0   :  { %9 = vsyncpa [#allocation4], 0  ;;  %s695_s0 = inlined_call_operand.vmem [shape: f32[2,16,4], index: 0, kind: input, shape index: {}]   ;;  %s696_s1 = inlined_call_operand.vmem [shape: f32[12,128], index: 1, kind: input, shape index: {}]   ;;  %s697_s2 = inlined_call_operand.hbm [shape: f32[2,1,128], index: 2, kind: output, shape index: {0}]   ;;  %s698_s3 = inlined_call_operand.hbm [shape: f32[2,1,128], index: 3, kind: output, shape index: {1}]  }
   0x1   :  { %11 = vsyncpa [#allocation4 + $0x1], 0 }
   0x2   :  { %12 = vsyncpa [#allocation6], 0 }
   0x3   :  { %14 = vsyncpa [#allocation6 + $0x1], 0  ;;  %s562_s12 = smov 0   ;;  %s564_s13 = smov 0  }
   0x4   :  { %s566_s14 = smov 0   ;;  %s568_s15 = smov 0  }
   0x5 LB: > { %s583_s16 = sadd.s32 4294967295, %s537_s15   ;;  %s382_s17 = sadd.s32 4294967294, %s537_s15   ;;  %s537_s15 = sphi %s568_s15, %s704_s15   ;;  %s533_s14 = sphi %s566_s14, %s703_s14   ;;  %s529_s13 = sphi %s564_s13, %s702_s13   ;;  %s525_s12 = sphi %s562_s12, %s701_s12  }
   0x6   : > { %s587_s18 = sadd.s32 1, %s537_s15   ;;  %s74_s19 = sadd.s32 1, %s533_s14 }
   0x7   : > { %s71_s20 = ssub.s32 %s537_s15, %s587_s18  ;;  %p84_p0 = scmp.ne.s32.totalorder %s533_s14, %s529_s13 }
   0x8   : > { %p72_p1 = scmp.eq.s32.totalorder %s71_s20, 0  ;;  %p85_p2 = scmp.eq.s32.totalorder %s583_s16, 1 }
   0x9   : > { %p90_p3 = scmp.ne.s32.totalorder %s529_s13, %s525_s12  ;;  %p91_p4 = scmp.eq.s32.totalorder %s382_s17, 1 }
   0xa   : > { %s598_s21 = scalar_select %p72_p1, %s533_s14, %s74_s19  }
   0xb   : > { %p600_p5 = por %p85_p2, %p84_p0  ;;  %p604_p6 = por %p91_p4, %p90_p3 }
   0xc   : > { %p385_p7 = scmp.ge.s32.totalorder %s537_s15, 1  ;;  %p146_p8 = scmp.lt.s32.totalorder %s537_s15, 3 }
   0xe   : > { %p147_p9 = pnand %p385_p7, %p146_p8 }
   0xf   : > { %p173_p10 = scmp.lt.s32.totalorder (!%p147_p9), %s583_s16, 1  ;;  %s540_s29 = smov (!%p147_p9), 4  }
  0x10   : > { %150 = sbr.rel (%p147_p9) target bundleno = 313 (0x139), region = 28  ;;  %s541_s30 = smov (!%p147_p9), 8  }
  0x11   : > { %s626_s8 = sand.u32 (!%p147_p9), 1, %s529_s13   ;;  %s282_s11 = scalar_lea.hbm (!%p147_p9), %s697_s2, %s583_s16 }
  0x12   : > { %s295_s20 = scalar_lea.hbm (!%p147_p9), %s698_s3, %s583_s16  ;;  %s639_s26 = sshll.u32 (!%p147_p9), %s282_s11, 4  ;;  %s287_s26 = int_to_ptr.hbm [resolvable:$true] %s639_s26 }
  0x13   : > { %s172_s27 = scalar_lea.vmem (!%p147_p9), [#allocation5], %s626_s8  ;;  %s463_s7 = scalar_lea.hbm (!%p147_p9), %s697_s2, 2 }
  0x15   : > { %vm178_vm0 = vcmask 97280   ;;  %v539_v0 = vmov 0.0   ;;  %s174_s24 = scalar_select %p173_p10, %s583_s16, 1  ;;  %vm183_vm1 = vcmask 31744   ;;  %v217_v5 = vld [vmem:[%s696_s1 + $0x8] sm:$0xf] }
  0x16   : > { %179 = vst.msk [vmem:[#allocation2] sm:$0xff] %vm178_vm0, %v539_v0  ;;  %vm224_vm2 = vcmask 1043456   ;;  %vm185_vm3 = vcmask 30720   ;;  %v216_v7 = vld [vmem:[%s696_s1] sm:$0xff]  ;;  %vm197_vm4 = vcmask 64544   ;;  %vm210_vm5 = vcmask 97344  }
  0x17   : > { %180 = vst.msk [vmem:[#allocation2 + $0x8] sm:$0xff] %vm178_vm0, %v539_v0  ;;  %s393_s25 = sshll.u32 %s174_s24, 4  ;;  %388 = vmatpush.msk.msra.mxu0 %vm224_vm2, %v217_v5  ;;  %394 = vmatpush.msk.msra.mxu1 %vm224_vm2, %v217_v5  ;;  %vm212_vm6 = vcmask 96320   ;;  %s166_s24 = scalar_lea.vmem [#allocation3], %s626_s8 }
  0x18   : > { %s177_s28 = scalar_lea.vmem %s695_s0, %s393_s25  ;;  %s637_s25 = sshll.u32 %s166_s24, 4  ;;  %s285_s25 = int_to_ptr.vmem [resolvable:$true] %s637_s25 }
  0x19   : > { %v187_v1 = vld [vmem:[%s177_s28] sm:$0xff]  ;;  %v188_v3 = vld [vmem:[%s177_s28 + $0x8] sm:$0xff]  ;;  %243 = vmatpush.msra.mxu0 %v216_v7  ;;  %395 = vmatpush.msra.mxu1 %v216_v7  ;;  %s270_s16 = scalar_lea.sflag [#allocation4], %s626_s8 }
  0x1a   : > { %v200_v2 = vld [vmem:[%s177_s28 + $0x1] sm:$0xff]  ;;  %191 = vrot.lane.b32.xlu0 %v187_v1, %s540_s29  ;;  %184 = vst.msk [vmem:[#allocation2 + $0x1] sm:$0xff] %vm183_vm1, %v187_v1  ;;  %v201_v4 = vld [vmem:[%s177_s28 + $0x9] sm:$0x7f] }
  0x1b   : > { %204 = vrot.lane.b32.xlu1 %v200_v2, %s541_s30  ;;  %v182_v6 = vld [vmem:[%s177_s28 + $0x8] sm:$0x7f]  ;;  %s642_s28 = sshll.u32 %s172_s27, 4  ;;  %s298_s28 = int_to_ptr.vmem [resolvable:$true] %s642_s28 }
  0x1c   : > { %186 = vst.msk [vmem:[#allocation2 + $0x9] sm:$0x7f] %vm185_vm3, %v182_v6 }
  0x22   : > { %193 = vrot.lane.b32.xlu0 %v188_v3, %s540_s29  ;;  %s644_s29 = sshll.u32 %s295_s20, 4  ;;  %s300_s29 = int_to_ptr.hbm [resolvable:$true] %s644_s29 }
  0x23   : > { %206 = vrot.lane.b32.xlu1 %v201_v4, %s541_s30  ;;  %s457_s30 = sshra.s32 %s287_s26, 4  ;;  %s458_s30 = int_to_ptr.hbm [resolvable:$true] %s457_s30 }
  0x24   : > { %s459_s4 = scalar_lea.hbm %s458_s30, 1  ;;  %p464_p0 = scmp.lt.s32.totalorder %s458_s30, %s697_s2 }
  0x25   : > { %p460_p11 = scmp.ne.s32.totalorder %s458_s30, %s459_s4  ;;  %p465_p1 = scmp.lt.s32.totalorder %s463_s7, %s459_s4 }
  0x27   : > { %p461_p12 = pnand %p460_p11, %p600_p5  ;;  %p466_p2 = por %p465_p1, %p464_p0 }
  0x29   : > { %p462_p13 = pneg %p461_p12 }
  0x2b   : > { %p467_p3 = pnand %p466_p2, %p462_p13 }
  0x8c   : > { %v192_v8 = vpop.permute.xlu0 %191 }
  0x8d   : > { %v205_v9 = vpop.permute.xlu1 %204  ;;  %198 = vst.msk [vmem:[#allocation2] sm:$0xff] %vm197_vm4, %v192_v8 }
  0x8e   : > { %211 = vst.msk [vmem:[#allocation2] sm:$0xff] %vm210_vm5, %v205_v9 }
  0x94   : > { %v194_v10 = vpop.permute.xlu0 %193 }
  0x95   : > { %v207_v11 = vpop.permute.xlu1 %206  ;;  %199 = vst.msk [vmem:[#allocation2 + $0x8] sm:$0xff] %vm197_vm4, %v194_v10  ;;  %v214_v12 = vld [vmem:[#allocation2] sm:$0xff] }
  0x96   : > { %213 = vst.msk [vmem:[#allocation2 + $0x8] sm:$0x7f] %vm212_vm6, %v207_v11  ;;  %389 = vmatmul.msk.f32.vlgmr.msra.gmra.mxu0 %vm178_vm0, %v214_v12 }
  0x9d   : > { %v215_v13 = vld [vmem:[#allocation2 + $0x8] sm:$0xff] }
  0x9e   : > { %390 = vmatmul.msk.f32.vlgmr.msra.gmra.mxu1 %vm178_vm0, %v215_v13 }
 0x113   : > { %v245_v14 = vpop.f32.mrf.mxu0 }
 0x114   : > { %v259_v16 = vmul.f32 %v245_v14, %v245_v14 }
 0x11b   : > { %v248_v15 = vpop.f32.mrf.mxu1 }
 0x11c   : > { %v251_v17 = vadd.f32 %v248_v15, %v245_v14  ;;  %v260_v18 = vmul.f32 %v248_v15, %v248_v15 }
 0x11e   : > { %v252_v19 = vrot.slane %v251_v17, 4  ;;  %v261_v20 = vadd.f32 %v260_v18, %v259_v16 }
 0x120   : > { %v253_v21 = vadd.f32 %v252_v19, %v251_v17  ;;  %v262_v22 = vrot.slane %v261_v20, 4 }
 0x122   : > { %v254_v23 = vrot.slane %v253_v21, 2  ;;  %v263_v24 = vadd.f32 %v262_v22, %v261_v20 }
 0x124   : > { %v255_v25 = vadd.f32 %v254_v23, %v253_v21  ;;  %v264_v26 = vrot.slane %v263_v24, 2 }
 0x126   : > { %v256_v27 = vrot.slane %v255_v25, 1  ;;  %v265_v28 = vadd.f32 %v264_v26, %v263_v24 }
 0x128   : > { %v257_v29 = vadd.f32 %v256_v27, %v255_v25  ;;  %v266_v30 = vrot.slane %v265_v28, 1 }
 0x12a   : > { %258 = vst [vmem:[%s166_s24] sm:$0x1] %v257_v29  ;;  %v267_v31 = vadd.f32 %v266_v30, %v265_v28 }
 0x12b   : > { %470 = shalt.err (!%p467_p3)
}
 0x12c   : > { %396 = dma.vmem_to_hbm [thread:$0]  (%p600_p5), %s285_s25, 16, %s287_s26, %s270_s16   ;;  %268 = vst [vmem:[%s172_s27] sm:$0x1] %v267_v31 }
 0x12d   : > { %s274_s11 = scalar_lea.sflag [#allocation6], %s626_s8  ;;  %s485_s17 = sshra.s32 %s300_s29, 4  ;;  %s486_s17 = int_to_ptr.hbm [resolvable:$true] %s485_s17 }
 0x12e   : > { %s487_s19 = scalar_lea.hbm %s486_s17, 1  ;;  %s491_s30 = scalar_lea.hbm %s698_s3, 2 }
 0x12f   : > { %p488_p4 = scmp.ne.s32.totalorder %s486_s17, %s487_s19  ;;  %p492_p9 = scmp.lt.s32.totalorder %s486_s17, %s698_s3 }
 0x130   : > { %p493_p10 = scmp.lt.s32.totalorder %s491_s30, %s487_s19 }
 0x131   : > { %p489_p7 = pnand %p488_p4, %p600_p5 }
 0x132   : > { %p494_p11 = por %p493_p10, %p492_p9 }
 0x133   : > { %p490_p8 = pneg %p489_p7 }
 0x135   : > { %p495_p12 = pnand %p494_p11, %p490_p8 }
 0x137   : > { %498 = shalt.err (!%p495_p12)
}
 0x138   : > { %397 = dma.vmem_to_hbm [thread:$0]  (%p600_p5), %s298_s28, 16, %s300_s29, %s274_s11  }
 0x139 PF: > { %p407_p13 = scmp.ge.s32.totalorder %s537_s15, 2  ;;  %s311_s8 = sand.u32 1, %s525_s12  }
 0x13a   : > { %s312_s25 = scalar_lea.sflag [#allocation4], %s311_s8 }
 0x13b   : > { %p401_p0 = pnand %p407_p13, %p604_p6 }
 0x13d   : > { %p402_p1 = pneg %p401_p0 }
 0x13f   : > { %516 = dma.done.wait (%p402_p1), %s312_s25, 16  }
 0x140   : > { %518 = vsyncadd (%p402_p1), %s312_s25, 4294967280  ;;  %s321_s26 = scalar_lea.sflag [#allocation6], %s311_s8 }
 0x141   : > { %520 = dma.done.wait (%p402_p1), %s321_s26, 16  }
 0x142   : > { %522 = vsyncadd (%p402_p1), %s321_s26, 4294967280  ;;  %p17_p5 = scmp.ge.s32.totalorder %s587_s18, 4   ;;  %s701_s12 = smov %s529_s13 }
 0x143   : > { %s702_s13 = smov %s533_s14  ;;  %s703_s14 = smov %s598_s21 }
 0x144   : > { %s704_s15 = smov %s587_s18  ;;  %19 = sbr.rel (!%p17_p5) target bundleno = 5 (0x5), region = 80 }
 0x149   :  { %326 = vsyncpa [#allocation4], 1 }
 0x14a   :  { %328 = vsyncpa [#allocation4 + $0x1], 1 }
 0x14b   :  { %329 = vsyncpa [#allocation6], 1 }
 0x14c   :  { %331 = vsyncpa [#allocation6 + $0x1], 1 }

</bundles_post_ra>
